<compile_context>
chip_gen: v6e
topology: v6e:2x2x1
jax: 0.10.0
libtpu: 0.0.40
codegen_flags: <defaults>
</compile_context>

<pallas_src>
import functools

import numpy as np
import jax
import jax.numpy as jnp
from jax.experimental import pallas as pl
from jax.experimental.pallas import tpu as pltpu


def _make_blur_taps(kernel=None, normalize=True, flip=False):
    """1-D separable factor of the BlurLayer 2-D kernel outer(k, k)."""
    if kernel is None:
        kernel = [1, 2, 1]
    k = np.asarray(kernel, dtype=np.float32)
    if normalize:
        # outer(k, k) / sum(outer(k, k)) == outer(k / sum(k), k / sum(k))
        k = k / k.sum()
    if flip:
        k = k[::-1]
    return [float(v) for v in k]


def _ceil_div(a, b):
    return -(-a // b)


def _conv_ranges(in_size, out_size, kk, pad, stride):
    """Split output positions into a fully-valid interior slice plus the
    (static, small) edge positions whose taps run off the input."""
    lo = max(_ceil_div(pad, stride), 0)
    hi = min((in_size - kk + pad) // stride, out_size - 1)
    if hi < lo:
        return 0, 0, list(range(out_size))
    edges = list(range(0, lo)) + list(range(hi + 1, out_size))
    return lo, hi - lo + 1, edges


def _vmem_capacity_bytes():
    try:
        info = pltpu.get_tpu_info()
        cap = int(getattr(info, "vmem_capacity_bytes", 0))
        if cap > 0:
            return cap
    except Exception:
        pass
    return 64 << 20  # conservative (v7x-sized) fallback


def _blur_kernel_body(x_ref, o_ref, tmp_ref, *, taps, pad, stride,
                      h, w, h_out, w_out):
    """Blur one channels-last (H, W, Ct) plane.

    x_ref   : (1, H, W, Ct)          input tile (VMEM)
    o_ref   : (1, H_out, W_out, Ct)  output tile (VMEM)
    tmp_ref : (H_out, W, Ct)         vertical-pass scratch (VMEM)
    """
    kk = len(taps)
    f32 = jnp.float32

    # ---- Pass 1: vertical (H) taps.  Row shifts / H-strides are plain address
    # arithmetic (H is neither the sublane nor the lane dim).
    r_lo, n_r, r_edges = _conv_ranges(h, h_out, kk, pad, stride)

    if n_r > 0:
        acc = None
        for di, t in enumerate(taps):
            start = r_lo * stride + di - pad
            rows = pl.ds(start, n_r) if stride == 1 else pl.ds(start, n_r, stride)
            term = t * x_ref[0, rows, :, :].astype(f32)
            acc = term if acc is None else acc + term
        tmp_ref[pl.ds(r_lo, n_r), :, :] = acc.astype(tmp_ref.dtype)

    for r in r_edges:                       # partial-tap rows at the image edge
        acc = None
        for di, t in enumerate(taps):
            src = r * stride + di - pad
            if 0 <= src < h:
                term = t * x_ref[0, pl.ds(src, 1), :, :].astype(f32)
                acc = term if acc is None else acc + term
        tmp_ref[pl.ds(r, 1), :, :] = acc.astype(tmp_ref.dtype)

    # ---- Pass 2: horizontal (W) taps on the row-blurred plane.  For stride>1
    # the accumulation is unstrided and the W stride is applied exactly once.
    j_lo, n_j, j_edges = _conv_ranges(w, w_out, kk, pad, stride)

    if n_j > 0:
        n_full = (n_j - 1) * stride + 1     # unstrided accumulation width
        acc = None
        for dj, t in enumerate(taps):
            cols = pl.ds(j_lo * stride + dj - pad, n_full)
            term = t * tmp_ref[:, cols, :].astype(f32)
            acc = term if acc is None else acc + term
        if stride > 1:                      # single strided select, not per-tap
            acc = jax.lax.slice_in_dim(acc, 0, n_full, stride=stride, axis=1)
        o_ref[0, :, pl.ds(j_lo, n_j), :] = acc.astype(o_ref.dtype)

    for j in j_edges:                       # partial-tap columns at the edge
        acc = None
        for dj, t in enumerate(taps):
            src = j * stride + dj - pad
            if 0 <= src < w:
                term = t * tmp_ref[:, pl.ds(src, 1), :].astype(f32)
                acc = term if acc is None else acc + term
        o_ref[0, :, pl.ds(j, 1), :] = acc.astype(o_ref.dtype)


def _pick_c_tile(c, h, w, h_out, w_out, in_itemsize, tmp_itemsize,
                 budget, block_cap):
    """Largest 128-multiple channel tile whose exact VMEM residency
    (2x double-buffered in/out blocks + 1x scratch) fits the budget."""
    def resident(ct):
        in_blk = h * w * ct * in_itemsize
        out_blk = h_out * w_out * ct * in_itemsize
        tmp = h_out * w * ct * tmp_itemsize
        return 2 * in_blk + 2 * out_blk + tmp, in_blk

    if c % 128 != 0:
        # TODO(synk): small / non-128-aligned C wastes lane bandwidth in this
        # channels-last layout (masked vst); add a native-NCHW (W-on-lanes) or
        # pad-to-128 path for those shapes.
        return c, resident(c)[0]

    ct = 128
    while c % (2 * ct) == 0:
        nxt, blk = resident(2 * ct)
        if nxt > budget or blk > block_cap:
            break
        ct *= 2
    return ct, resident(ct)[0]


def blur_layer_nhwc(x, kernel=None, normalize=True, flip=False, stride=1):
    """Forward pass of BlurLayer on channels-last input. x: (N, H, W, C)."""
    taps = _make_blur_taps(kernel, normalize, flip)
    kk = len(taps)
    pad = (kk - 1) // 2
    stride = int(stride)

    n, h, w, c = x.shape
    h_out = (h + 2 * pad - kk) // stride + 1
    w_out = (w + 2 * pad - kk) // stride + 1

    in_itemsize = int(jnp.dtype(x.dtype).itemsize)
    # bf16 inputs keep a bf16 intermediate (halves scratch bytes / tmp stores
    # on v6e/v7x); everything else goes through an f32 intermediate.
    tmp_dtype = x.dtype if x.dtype == jnp.bfloat16 else jnp.float32
    tmp_itemsize = int(jnp.dtype(tmp_dtype).itemsize)

    # Generation-aware VMEM budget: ~75% of physical capacity for resident
    # buffers (~96 MiB on v5e/v6e's 128 MiB, ~48 MiB on v7x's 64 MiB).
    cap = _vmem_capacity_bytes()
    budget = (cap * 3) // 4
    block_cap = cap // 8                      # per input block (8 / 16 MiB)
    c_t, resident = _pick_c_tile(c, h, w, h_out, w_out, in_itemsize,
                                 tmp_itemsize, budget, block_cap)
    n_ct = c // c_t
    # TODO(synk): tile H (with a kk-1 row halo) for planes whose (H, W, C_tile)
    # residency still exceeds the budget (huge H*W with small C); that would
    # also give both v7x TensorCores work when N == 1 and C <= 128.

    vmem_limit = int(min((cap * 7) // 8, max(resident + resident // 4, 32 << 20)))

    kern = functools.partial(
        _blur_kernel_body, taps=taps, pad=pad, stride=stride,
        h=h, w=w, h_out=h_out, w_out=w_out)

    cost = pl.CostEstimate(
        flops=2 * (2 * kk) * n * h_out * w_out * c,
        transcendentals=0,
        bytes_accessed=(n * h * w * c + n * h_out * w_out * c) * in_itemsize)

    return pl.pallas_call(
        kern,
        out_shape=jax.ShapeDtypeStruct((n, h_out, w_out, c), x.dtype),
        grid=(n, n_ct),
        in_specs=[pl.BlockSpec((1, h, w, c_t), lambda i, j: (i, 0, 0, j))],
        out_specs=pl.BlockSpec((1, h_out, w_out, c_t), lambda i, j: (i, 0, 0, j)),
        scratch_shapes=[pltpu.VMEM((h_out, w, c_t), tmp_dtype)],
        compiler_params=pltpu.CompilerParams(
            dimension_semantics=("parallel", "parallel"),
            vmem_limit_bytes=vmem_limit),
        cost_estimate=cost,
    )(x)


def blur_layer(x, kernel=None, normalize=True, flip=False, stride=1):
    """Forward pass of BlurLayer, NCHW in / NCHW out (matches the PyTorch
    module).  The two transposes below are full extra HBM passes executed by
    XLA; callers that already keep activations channels-last should call
    blur_layer_nhwc directly and skip them."""
    x_cl = jnp.transpose(x, (0, 2, 3, 1))                  # (N, H, W, C)
    y_cl = blur_layer_nhwc(x_cl, kernel, normalize, flip, stride)
    return jnp.transpose(y_cl, (0, 3, 1, 2))               # (N, C, H', W')


def _blur_reference(x, kernel=None, normalize=True, flip=False, stride=1):
    """Pure-JAX reference (depthwise conv) for the correctness check."""
    if kernel is None:
        kernel = [1, 2, 1]
    k = jnp.asarray(kernel, dtype=jnp.float32)
    k2 = k[:, None] * k[None, :]
    if normalize:
        k2 = k2 / jnp.sum(k2)
    if flip:
        k2 = k2[::-1, ::-1]
    c = x.shape[1]
    kh, kw = k2.shape
    pad = int((kh - 1) // 2)
    wgt = jnp.broadcast_to(k2[None, None], (c, 1, kh, kw))  # OIHW, groups=C
    return jax.lax.conv_general_dilated(
        x, wgt,
        window_strides=(stride, stride),
        padding=[(pad, pad), (pad, pad)],
        dimension_numbers=("NCHW", "OIHW", "NCHW"),
        feature_group_count=c,
    )


if __name__ == "__main__":
    key = jax.random.PRNGKey(0)
    x = jax.random.normal(key, (2, 4, 16, 16), dtype=jnp.float32)

    y = blur_layer(x)
    jax.block_until_ready(y)

    y_ref = _blur_reference(x)
    assert y.shape == y_ref.shape, (y.shape, y_ref.shape)
    err = float(jnp.max(jnp.abs(y - y_ref)))
    assert err < 1e-5, err

    print("KERNEL_OK")
</pallas_src>

<mosaic_0001>
module attributes {stable_mosaic.version = 11 : i64} {
  func.func @_blur_kernel_body(%arg0: i32, %arg1: i32, %arg2: memref<1x16x16x4xf32, #tpu.memory_space<vmem>>, %arg3: memref<1x16x16x4xf32, #tpu.memory_space<vmem>>, %arg4: memref<16x16x4xf32, #tpu.memory_space<vmem>>) attributes {dimension_semantics = [#tpu.dimension_semantics<parallel>, #tpu.dimension_semantics<parallel>], iteration_bounds = array<i64: 2, 1>, scalar_prefetch = 0 : i64, scratch_operands = 1 : i64, tpu.core_type = #tpu.core_type<tc>, window_params = [{transform_indices = @transform_0, window_bounds = array<i64: 1, 16, 16, 4>}, {transform_indices = @transform_1, window_bounds = array<i64: 1, 16, 16, 4>}]} {
    %c0 = arith.constant 0 : index
    %c0_0 = arith.constant 0 : index
    %c0_1 = arith.constant 0 : index
    %c0_2 = arith.constant 0 : index
    %0 = vector.load %arg2[%c0, %c0_0, %c0_1, %c0_2] : memref<1x16x16x4xf32, #tpu.memory_space<vmem>>, vector<1x14x16x4xf32>
    %1 = vector.shape_cast %0 : vector<1x14x16x4xf32> to vector<14x16x4xf32>
    %cst = arith.constant 2.500000e-01 : f32
    %2 = vector.broadcast %cst : f32 to vector<14x16x4xf32>
    %3 = arith.mulf %2, %1 : vector<14x16x4xf32>
    %c0_3 = arith.constant 0 : index
    %c1 = arith.constant 1 : index
    %c0_4 = arith.constant 0 : index
    %c0_5 = arith.constant 0 : index
    %4 = vector.load %arg2[%c0_3, %c1, %c0_4, %c0_5] : memref<1x16x16x4xf32, #tpu.memory_space<vmem>>, vector<1x14x16x4xf32>
    %5 = vector.shape_cast %4 : vector<1x14x16x4xf32> to vector<14x16x4xf32>
    %cst_6 = arith.constant 5.000000e-01 : f32
    %6 = vector.broadcast %cst_6 : f32 to vector<14x16x4xf32>
    %7 = arith.mulf %6, %5 : vector<14x16x4xf32>
    %8 = arith.addf %3, %7 : vector<14x16x4xf32>
    %c0_7 = arith.constant 0 : index
    %c2 = arith.constant 2 : index
    %c0_8 = arith.constant 0 : index
    %c0_9 = arith.constant 0 : index
    %9 = vector.load %arg2[%c0_7, %c2, %c0_8, %c0_9] : memref<1x16x16x4xf32, #tpu.memory_space<vmem>>, vector<1x14x16x4xf32>
    %10 = vector.shape_cast %9 : vector<1x14x16x4xf32> to vector<14x16x4xf32>
    %cst_10 = arith.constant 2.500000e-01 : f32
    %11 = vector.broadcast %cst_10 : f32 to vector<14x16x4xf32>
    %12 = arith.mulf %11, %10 : vector<14x16x4xf32>
    %13 = arith.addf %8, %12 : vector<14x16x4xf32>
    %c1_11 = arith.constant 1 : index
    %c0_12 = arith.constant 0 : index
    %c0_13 = arith.constant 0 : index
    %14 = vector.load %arg4[%c1_11, %c0_12, %c0_13] : memref<16x16x4xf32, #tpu.memory_space<vmem>>, vector<14x16x4xf32>
    tpu.vector_store %arg4[%c1_11, %c0_12, %c0_13], %13 {strides = array<i32>} : memref<16x16x4xf32, #tpu.memory_space<vmem>>, vector<14x16x4xf32>,
    %c0_14 = arith.constant 0 : index
    %c0_15 = arith.constant 0 : index
    %c0_16 = arith.constant 0 : index
    %c0_17 = arith.constant 0 : index
    %15 = vector.load %arg2[%c0_14, %c0_15, %c0_16, %c0_17] : memref<1x16x16x4xf32, #tpu.memory_space<vmem>>, vector<1x1x16x4xf32>
    %16 = vector.shape_cast %15 : vector<1x1x16x4xf32> to vector<1x16x4xf32>
    %cst_18 = arith.constant 5.000000e-01 : f32
    %17 = vector.broadcast %cst_18 : f32 to vector<1x16x4xf32>
    %18 = arith.mulf %17, %16 : vector<1x16x4xf32>
    %c0_19 = arith.constant 0 : index
    %c1_20 = arith.constant 1 : index
    %c0_21 = arith.constant 0 : index
    %c0_22 = arith.constant 0 : index
    %19 = vector.load %arg2[%c0_19, %c1_20, %c0_21, %c0_22] : memref<1x16x16x4xf32, #tpu.memory_space<vmem>>, vector<1x1x16x4xf32>
    %20 = vector.shape_cast %19 : vector<1x1x16x4xf32> to vector<1x16x4xf32>
    %cst_23 = arith.constant 2.500000e-01 : f32
    %21 = vector.broadcast %cst_23 : f32 to vector<1x16x4xf32>
    %22 = arith.mulf %21, %20 : vector<1x16x4xf32>
    %23 = arith.addf %18, %22 : vector<1x16x4xf32>
    %c0_24 = arith.constant 0 : index
    %c0_25 = arith.constant 0 : index
    %c0_26 = arith.constant 0 : index
    %24 = vector.load %arg4[%c0_24, %c0_25, %c0_26] : memref<16x16x4xf32, #tpu.memory_space<vmem>>, vector<1x16x4xf32>
    tpu.vector_store %arg4[%c0_24, %c0_25, %c0_26], %23 {strides = array<i32>} : memref<16x16x4xf32, #tpu.memory_space<vmem>>, vector<1x16x4xf32>,
    %c0_27 = arith.constant 0 : index
    %c14 = arith.constant 14 : index
    %c0_28 = arith.constant 0 : index
    %c0_29 = arith.constant 0 : index
    %25 = vector.load %arg2[%c0_27, %c14, %c0_28, %c0_29] : memref<1x16x16x4xf32, #tpu.memory_space<vmem>>, vector<1x1x16x4xf32>
    %26 = vector.shape_cast %25 : vector<1x1x16x4xf32> to vector<1x16x4xf32>
    %cst_30 = arith.constant 2.500000e-01 : f32
    %27 = vector.broadcast %cst_30 : f32 to vector<1x16x4xf32>
    %28 = arith.mulf %27, %26 : vector<1x16x4xf32>
    %c0_31 = arith.constant 0 : index
    %c15 = arith.constant 15 : index
    %c0_32 = arith.constant 0 : index
    %c0_33 = arith.constant 0 : index
    %29 = vector.load %arg2[%c0_31, %c15, %c0_32, %c0_33] : memref<1x16x16x4xf32, #tpu.memory_space<vmem>>, vector<1x1x16x4xf32>
    %30 = vector.shape_cast %29 : vector<1x1x16x4xf32> to vector<1x16x4xf32>
    %cst_34 = arith.constant 5.000000e-01 : f32
    %31 = vector.broadcast %cst_34 : f32 to vector<1x16x4xf32>
    %32 = arith.mulf %31, %30 : vector<1x16x4xf32>
    %33 = arith.addf %28, %32 : vector<1x16x4xf32>
    %c15_35 = arith.constant 15 : index
    %c0_36 = arith.constant 0 : index
    %c0_37 = arith.constant 0 : index
    %34 = vector.load %arg4[%c15_35, %c0_36, %c0_37] : memref<16x16x4xf32, #tpu.memory_space<vmem>>, vector<1x16x4xf32>
    tpu.vector_store %arg4[%c15_35, %c0_36, %c0_37], %33 {strides = array<i32>} : memref<16x16x4xf32, #tpu.memory_space<vmem>>, vector<1x16x4xf32>,
    %c0_38 = arith.constant 0 : index
    %c0_39 = arith.constant 0 : index
    %c0_40 = arith.constant 0 : index
    %35 = vector.load %arg4[%c0_38, %c0_39, %c0_40] : memref<16x16x4xf32, #tpu.memory_space<vmem>>, vector<16x14x4xf32>
    %cst_41 = arith.constant 2.500000e-01 : f32
    %36 = vector.broadcast %cst_41 : f32 to vector<16x14x4xf32>
    %37 = arith.mulf %36, %35 : vector<16x14x4xf32>
    %c0_42 = arith.constant 0 : index
    %c1_43 = arith.constant 1 : index
    %c0_44 = arith.constant 0 : index
    %38 = vector.load %arg4[%c0_42, %c1_43, %c0_44] : memref<16x16x4xf32, #tpu.memory_space<vmem>>, vector<16x14x4xf32>
    %cst_45 = arith.constant 5.000000e-01 : f32
    %39 = vector.broadcast %cst_45 : f32 to vector<16x14x4xf32>
    %40 = arith.mulf %39, %38 : vector<16x14x4xf32>
    %41 = arith.addf %37, %40 : vector<16x14x4xf32>
    %c0_46 = arith.constant 0 : index
    %c2_47 = arith.constant 2 : index
    %c0_48 = arith.constant 0 : index
    %42 = vector.load %arg4[%c0_46, %c2_47, %c0_48] : memref<16x16x4xf32, #tpu.memory_space<vmem>>, vector<16x14x4xf32>
    %cst_49 = arith.constant 2.500000e-01 : f32
    %43 = vector.broadcast %cst_49 : f32 to vector<16x14x4xf32>
    %44 = arith.mulf %43, %42 : vector<16x14x4xf32>
    %45 = arith.addf %41, %44 : vector<16x14x4xf32>
    %c0_50 = arith.constant 0 : index
    %c0_51 = arith.constant 0 : index
    %c1_52 = arith.constant 1 : index
    %c0_53 = arith.constant 0 : index
    %46 = vector.load %arg3[%c0_50, %c0_51, %c1_52, %c0_53] : memref<1x16x16x4xf32, #tpu.memory_space<vmem>>, vector<1x16x14x4xf32>
    %47 = vector.shape_cast %46 : vector<1x16x14x4xf32> to vector<16x14x4xf32>
    %48 = vector.shape_cast %45 : vector<16x14x4xf32> to vector<1x16x14x4xf32>
    tpu.vector_store %arg3[%c0_50, %c0_51, %c1_52, %c0_53], %48 {strides = array<i32>} : memref<1x16x16x4xf32, #tpu.memory_space<vmem>>, vector<1x16x14x4xf32>,
    %c0_54 = arith.constant 0 : index
    %c0_55 = arith.constant 0 : index
    %c0_56 = arith.constant 0 : index
    %49 = vector.load %arg4[%c0_54, %c0_55, %c0_56] : memref<16x16x4xf32, #tpu.memory_space<vmem>>, vector<16x1x4xf32>
    %cst_57 = arith.constant 5.000000e-01 : f32
    %50 = vector.broadcast %cst_57 : f32 to vector<16x1x4xf32>
    %51 = arith.mulf %50, %49 : vector<16x1x4xf32>
    %c0_58 = arith.constant 0 : index
    %c1_59 = arith.constant 1 : index
    %c0_60 = arith.constant 0 : index
    %52 = vector.load %arg4[%c0_58, %c1_59, %c0_60] : memref<16x16x4xf32, #tpu.memory_space<vmem>>, vector<16x1x4xf32>
    %cst_61 = arith.constant 2.500000e-01 : f32
    %53 = vector.broadcast %cst_61 : f32 to vector<16x1x4xf32>
    %54 = arith.mulf %53, %52 : vector<16x1x4xf32>
    %55 = arith.addf %51, %54 : vector<16x1x4xf32>
    %c0_62 = arith.constant 0 : index
    %c0_63 = arith.constant 0 : index
    %c0_64 = arith.constant 0 : index
    %c0_65 = arith.constant 0 : index
    %56 = vector.load %arg3[%c0_62, %c0_63, %c0_64, %c0_65] : memref<1x16x16x4xf32, #tpu.memory_space<vmem>>, vector<1x16x1x4xf32>
    %57 = vector.shape_cast %56 : vector<1x16x1x4xf32> to vector<16x1x4xf32>
    %58 = vector.shape_cast %55 : vector<16x1x4xf32> to vector<1x16x1x4xf32>
    tpu.vector_store %arg3[%c0_62, %c0_63, %c0_64, %c0_65], %58 {strides = array<i32>} : memref<1x16x16x4xf32, #tpu.memory_space<vmem>>, vector<1x16x1x4xf32>,
    %c0_66 = arith.constant 0 : index
    %c14_67 = arith.constant 14 : index
    %c0_68 = arith.constant 0 : index
    %59 = vector.load %arg4[%c0_66, %c14_67, %c0_68] : memref<16x16x4xf32, #tpu.memory_space<vmem>>, vector<16x1x4xf32>
    %cst_69 = arith.constant 2.500000e-01 : f32
    %60 = vector.broadcast %cst_69 : f32 to vector<16x1x4xf32>
    %61 = arith.mulf %60, %59 : vector<16x1x4xf32>
    %c0_70 = arith.constant 0 : index
    %c15_71 = arith.constant 15 : index
    %c0_72 = arith.constant 0 : index
    %62 = vector.load %arg4[%c0_70, %c15_71, %c0_72] : memref<16x16x4xf32, #tpu.memory_space<vmem>>, vector<16x1x4xf32>
    %cst_73 = arith.constant 5.000000e-01 : f32
    %63 = vector.broadcast %cst_73 : f32 to vector<16x1x4xf32>
    %64 = arith.mulf %63, %62 : vector<16x1x4xf32>
    %65 = arith.addf %61, %64 : vector<16x1x4xf32>
    %c0_74 = arith.constant 0 : index
    %c0_75 = arith.constant 0 : index
    %c15_76 = arith.constant 15 : index
    %c0_77 = arith.constant 0 : index
    %66 = vector.load %arg3[%c0_74, %c0_75, %c15_76, %c0_77] : memref<1x16x16x4xf32, #tpu.memory_space<vmem>>, vector<1x16x1x4xf32>
    %67 = vector.shape_cast %66 : vector<1x16x1x4xf32> to vector<16x1x4xf32>
    %68 = vector.shape_cast %65 : vector<16x1x4xf32> to vector<1x16x1x4xf32>
    tpu.vector_store %arg3[%c0_74, %c0_75, %c15_76, %c0_77], %68 {strides = array<i32>} : memref<1x16x16x4xf32, #tpu.memory_space<vmem>>, vector<1x16x1x4xf32>,
    return
  }
  func.func @transform_0(%arg0: i32, %arg1: i32) -> (i32, i32, i32, i32) {
    %c0_i32 = arith.constant 0 : i32
    %c0_i32_0 = arith.constant 0 : i32
    %c0_i32_1 = arith.constant 0 : i32
    return %arg0, %c0_i32, %c0_i32_0, %arg1 : i32, i32, i32, i32
  }
  func.func @transform_1(%arg0: i32, %arg1: i32) -> (i32, i32, i32, i32) {
    %c0_i32 = arith.constant 0 : i32
    %c0_i32_0 = arith.constant 0 : i32
    %c0_i32_1 = arith.constant 0 : i32
    return %arg0, %c0_i32, %c0_i32_0, %arg1 : i32, i32, i32, i32
  }
}

</mosaic_0001>

<bundles_post_ra>
// kernel: tpu_custom_call.1
= control target key start
LH: loop header
LB: loop body
LE: loop exit
PB: predicated region body
PF: predicated region fallthrough
CT: control target
= control target key end

     0   :  { %s1129_s6 = smov 0   ;;  %s1131_s7 = smov 0   ;;  %s1389_s0 = inlined_call_operand.vmem [shape: f32[2,16,16,4], index: 0, kind: input, shape index: {}]   ;;  %s1390_s1 = inlined_call_operand.vmem [shape: f32[2,16,16,4], index: 1, kind: output, shape index: {}]  }
   0x1   :  { %s1133_s8 = smov 0  }
   0x2 LB: > { %s23_s9 = sadd.s32 1, %s1113_s7  ;;  %p1000_p0 = scmp.ge.s32.totalorder %s1117_s8, 1  ;;  %s1117_s8 = sphi %s1133_s8, %s11_s8   ;;  %s1113_s7 = sphi %s1131_s7, %s1392_s7   ;;  %s1109_s6 = sphi %s1129_s6, %s1391_s6  }
   0x3   : > { %p25_p1 = scmp.ge.s32.totalorder %s23_s9, 2  ;;  %p106_p2 = scmp.lt.s32.totalorder %s1117_s8, 3 }
   0x5   : > { %s1394_s9 = smov (%p25_p1, %s23_s9), 0  ;;  %p107_p3 = pnand %p1000_p0, %p106_p2 }
   0x6   : > { %p132_p4 = scmp.lt.s32.totalorder (!%p107_p3), %s1109_s6, 1 }
   0x7   : > { %110 = sbr.rel (%p107_p3) target bundleno = 139 (0x8b), region = 24 }
   0xc   : > { %s1396_s6 = smov (!%p132_p4, %s1109_s6), 1  ;;  %vm375_vm0 = vcmask 31744   ;;  %vm688_vm1 = vcmask 29696   ;;  %vm800_vm2 = vcmask 24576  }
   0xd   : > { %s1069_s10 = sshll.u32 %s1396_s6, 8 }
   0xe   : > { %s1155_s13 = scalar_lea.vmem %s1389_s0, %s1069_s10  ;;  %s1249_s16 = scalar_lea.vmem %s1390_s1, %s1069_s10 }
   0xf   : > { %v404_v0 = vld [vmem:[%s1155_s13] sm:$0xff]  ;;  %v1061_v1 = vld [vmem:[%s1155_s13 + $0x10] sm:$0xff]  ;;  %v405_v2 = vld [vmem:[%s1155_s13 + $0x8] sm:$0xff] }
  0x10   : > { %v406_v3 = vmul.f32 0.5, %v404_v0  ;;  %v410_v4 = vmul.f32 0.25, %v1061_v1  ;;  %v407_v5 = vmul.f32 0.5, %v405_v2  ;;  %v1062_v6 = vld [vmem:[%s1155_s13 + $0x18] sm:$0xff]  ;;  %v1162_v7 = vld [vmem:[%s1155_s13 + $0xe0] sm:$0xff]  ;;  %v1165_v8 = vld [vmem:[%s1155_s13 + $0xf0] sm:$0xff] }
  0x11   : > { %v411_v9 = vmul.f32 0.25, %v1062_v6  ;;  %v1168_v10 = vmul.f32 0.25, %v1162_v7  ;;  %v424_v11 = vmul.f32 0.5, %v1165_v8  ;;  %v1172_v12 = vld [vmem:[%s1155_s13 + $0xe8] sm:$0xff]  ;;  %v1175_v13 = vld [vmem:[%s1155_s13 + $0xf8] sm:$0xff]  ;;  %v176_v14 = vmul.f32 0.25, %v404_v0 }
  0x12   : > { %v412_v15 = vadd.f32 %v410_v4, %v406_v3  ;;  %v1178_v16 = vmul.f32 0.25, %v1172_v12  ;;  %v425_v17 = vmul.f32 0.5, %v1175_v13  ;;  %v233_v18 = vmul.f32 0.5, %v1061_v1  ;;  %v1033_v19 = vld [vmem:[%s1155_s13 + $0x20] sm:$0xff]  ;;  %v1034_v20 = vld [vmem:[%s1155_s13 + $0x28] sm:$0xff]  ;;  %v1035_v21 = vld [vmem:[%s1155_s13 + $0x30] sm:$0xff] }
  0x13   : > { %v413_v22 = vadd.f32 %v411_v9, %v407_v5  ;;  %v426_v23 = vadd.f32 %v424_v11, %v1168_v10  ;;  %v318_v24 = vmul.f32 0.25, %v1033_v19  ;;  %v177_v25 = vmul.f32 0.25, %v405_v2  ;;  %v1036_v26 = vld [vmem:[%s1155_s13 + $0x38] sm:$0xff]  ;;  %v1037_v27 = vld [vmem:[%s1155_s13 + $0x40] sm:$0xff]  ;;  %v1038_v32 = vld [vmem:[%s1155_s13 + $0x48] sm:$0xff] }
  0x14   : > { %414 = vst.msk [vmem:[#allocation2] sm:$0xff] %vm375_vm0, %v412_v15  ;;  %v427_v28 = vadd.f32 %v425_v17, %v1178_v16  ;;  %v261_v29 = vadd.f32 %v233_v18, %v176_v14  ;;  %v234_v30 = vmul.f32 0.5, %v1062_v6  ;;  %v319_v31 = vmul.f32 0.25, %v1034_v20  ;;  %v1039_v37 = vld [vmem:[%s1155_s13 + $0x50] sm:$0xff]  ;;  %v1040_v46 = vld [vmem:[%s1155_s13 + $0x58] sm:$0xff]  ;;  %v1041_v51 = vld [vmem:[%s1155_s13 + $0x60] sm:$0xff] }
  0x15   : > { %415 = vst.msk [vmem:[#allocation2 + $0x8] sm:$0xff] %vm375_vm0, %v413_v22  ;;  %429 = vst.msk [vmem:[#allocation2 + $0xf0] sm:$0xff] %vm375_vm0, %v426_v23  ;;  %v235_v33 = vmul.f32 0.5, %v1033_v19  ;;  %v320_v34 = vmul.f32 0.25, %v1035_v21  ;;  %v236_v35 = vmul.f32 0.5, %v1034_v20  ;;  %v321_v36 = vmul.f32 0.25, %v1036_v26 }
  0x16   : > { %430 = vst.msk [vmem:[#allocation2 + $0xf8] sm:$0xff] %vm375_vm0, %v427_v28  ;;  %v346_v38 = vadd.f32 %v318_v24, %v261_v29  ;;  %v262_v39 = vadd.f32 %v234_v30, %v177_v25  ;;  %v237_v40 = vmul.f32 0.5, %v1035_v21  ;;  %v322_v41 = vmul.f32 0.25, %v1037_v27  ;;  %v1042_v56 = vld [vmem:[%s1155_s13 + $0x68] sm:$0xff]  ;;  %v1043_v61 = vld [vmem:[%s1155_s13 + $0x70] sm:$0xff]  ;;  %v1044_v2 = vld [vmem:[%s1155_s13 + $0x78] sm:$0xff] }
  0x17   : > { %v263_v42 = vadd.f32 %v410_v4, %v235_v33  ;;  %v264_v43 = vadd.f32 %v411_v9, %v236_v35  ;;  %v238_v44 = vmul.f32 0.5, %v1036_v26  ;;  %v323_v45 = vmul.f32 0.25, %v1038_v32  ;;  %v1045_v9 = vld [vmem:[%s1155_s13 + $0x80] sm:$0xff]  ;;  %v1046_v18 = vld [vmem:[%s1155_s13 + $0x88] sm:$0xff]  ;;  %v1047_v23 = vld [vmem:[%s1155_s13 + $0x90] sm:$0xff] }
  0x18   : > { %376 = vst.msk [vmem:[#allocation2 + $0x10] sm:$0xff] %vm375_vm0, %v346_v38  ;;  %v347_v47 = vadd.f32 %v319_v31, %v262_v39  ;;  %v265_v48 = vadd.f32 %v318_v24, %v237_v40  ;;  %v239_v49 = vmul.f32 0.5, %v1037_v27  ;;  %v324_v50 = vmul.f32 0.25, %v1039_v37  ;;  %v1048_v28 = vld [vmem:[%s1155_s13 + $0x98] sm:$0xff]  ;;  %v1049_v33 = vld [vmem:[%s1155_s13 + $0xa0] sm:$0xff]  ;;  %v1050_v38 = vld [vmem:[%s1155_s13 + $0xa8] sm:$0xff] }
  0x19   : > { %v348_v52 = vadd.f32 %v320_v34, %v263_v42  ;;  %v349_v53 = vadd.f32 %v321_v36, %v264_v43  ;;  %v266_v54 = vadd.f32 %v319_v31, %v238_v44  ;;  %v240_v55 = vmul.f32 0.5, %v1038_v32  ;;  %v1051_v43 = vld [vmem:[%s1155_s13 + $0xb0] sm:$0xff] }
  0x1a   : > { %377 = vst.msk [vmem:[#allocation2 + $0x18] sm:$0xff] %vm375_vm0, %v347_v47  ;;  %v350_v57 = vadd.f32 %v322_v41, %v265_v48  ;;  %v267_v58 = vadd.f32 %v320_v34, %v239_v49  ;;  %v325_v59 = vmul.f32 0.25, %v1040_v46  ;;  %v241_v60 = vmul.f32 0.5, %v1039_v37  ;;  %v1052_v48 = vld [vmem:[%s1155_s13 + $0xb8] sm:$0xff] }
  0x1b   : > { %378 = vst.msk [vmem:[#allocation2 + $0x20] sm:$0xff] %vm375_vm0, %v348_v52  ;;  %379 = vst.msk [vmem:[#allocation2 + $0x28] sm:$0xff] %vm375_vm0, %v349_v53  ;;  %v351_v62 = vadd.f32 %v323_v45, %v266_v54  ;;  %v268_v63 = vadd.f32 %v321_v36, %v240_v55  ;;  %v326_v0 = vmul.f32 0.25, %v1041_v51  ;;  %v242_v1 = vmul.f32 0.5, %v1040_v46  ;;  %v1053_v53 = vld [vmem:[%s1155_s13 + $0xc0] sm:$0xff] }
  0x1c   : > { %380 = vst.msk [vmem:[#allocation2 + $0x30] sm:$0xff] %vm375_vm0, %v350_v57  ;;  %v352_v3 = vadd.f32 %v324_v50, %v267_v58  ;;  %v269_v4 = vadd.f32 %v322_v41, %v241_v60  ;;  %v327_v5 = vmul.f32 0.25, %v1042_v56  ;;  %v243_v6 = vmul.f32 0.5, %v1041_v51  ;;  %v1054_v58 = vld [vmem:[%s1155_s13 + $0xc8] sm:$0xff] }
  0x1d   : > { %381 = vst.msk [vmem:[#allocation2 + $0x38] sm:$0xff] %vm375_vm0, %v351_v62  ;;  %v353_v11 = vadd.f32 %v325_v59, %v268_v63  ;;  %v270_v14 = vadd.f32 %v323_v45, %v242_v1  ;;  %v328_v15 = vmul.f32 0.25, %v1043_v61  ;;  %v244_v17 = vmul.f32 0.5, %v1042_v56  ;;  %v1055_v63 = vld [vmem:[%s1155_s13 + $0xd0] sm:$0xff] }
  0x1e   : > { %382 = vst.msk [vmem:[#allocation2 + $0x40] sm:$0xff] %vm375_vm0, %v352_v3  ;;  %v354_v19 = vadd.f32 %v326_v0, %v269_v4  ;;  %v271_v20 = vadd.f32 %v324_v50, %v243_v6  ;;  %v329_v21 = vmul.f32 0.25, %v1044_v2  ;;  %v245_v22 = vmul.f32 0.5, %v1043_v61  ;;  %v1056_v4 = vld [vmem:[%s1155_s13 + $0xd8] sm:$0xff] }
  0x1f   : > { %383 = vst.msk [vmem:[#allocation2 + $0x48] sm:$0xff] %vm375_vm0, %v353_v11  ;;  %v355_v24 = vadd.f32 %v327_v5, %v270_v14  ;;  %v272_v25 = vadd.f32 %v325_v59, %v244_v17  ;;  %v330_v26 = vmul.f32 0.25, %v1045_v9  ;;  %v246_v27 = vmul.f32 0.5, %v1044_v2 }
  0x20   : > { %384 = vst.msk [vmem:[#allocation2 + $0x50] sm:$0xff] %vm375_vm0, %v354_v19  ;;  %v356_v29 = vadd.f32 %v328_v15, %v271_v20  ;;  %v273_v30 = vadd.f32 %v326_v0, %v245_v22  ;;  %v331_v31 = vmul.f32 0.25, %v1046_v18  ;;  %v247_v32 = vmul.f32 0.5, %v1045_v9  ;;  %v431_v19 = vld [vmem:[#allocation2] sm:$0xff] }
  0x21   : > { %385 = vst.msk [vmem:[#allocation2 + $0x58] sm:$0xff] %vm375_vm0, %v355_v24  ;;  %v357_v34 = vadd.f32 %v329_v21, %v272_v25  ;;  %v274_v35 = vadd.f32 %v327_v5, %v246_v27  ;;  %v332_v36 = vmul.f32 0.25, %v1047_v23  ;;  %v248_v37 = vmul.f32 0.5, %v1046_v18  ;;  %v495_v24 = vld [vmem:[#allocation2 + $0x1] sm:$0xff] }
  0x22   : > { %386 = vst.msk [vmem:[#allocation2 + $0x60] sm:$0xff] %vm375_vm0, %v356_v29  ;;  %v358_v39 = vadd.f32 %v330_v26, %v273_v30  ;;  %v275_v40 = vadd.f32 %v328_v15, %v247_v32  ;;  %v333_v41 = vmul.f32 0.25, %v1048_v28  ;;  %v249_v42 = vmul.f32 0.5, %v1047_v23  ;;  %v591_v25 = vld [vmem:[#allocation2 + $0x2] sm:$0xff]  ;;  %v592_v32 = vld [vmem:[#allocation2 + $0xa] sm:$0x3f] }
  0x23   : > { %387 = vst.msk [vmem:[#allocation2 + $0x68] sm:$0xff] %vm375_vm0, %v357_v34  ;;  %v359_v44 = vadd.f32 %v331_v31, %v274_v35  ;;  %v276_v45 = vadd.f32 %v329_v21, %v248_v37  ;;  %v334_v46 = vmul.f32 0.25, %v1049_v33  ;;  %v250_v47 = vmul.f32 0.5, %v1048_v28  ;;  %v461_v37 = vld [vmem:[#allocation2 + $0xf0] sm:$0xff] }
  0x24   : > { %388 = vst.msk [vmem:[#allocation2 + $0x70] sm:$0xff] %vm375_vm0, %v358_v39  ;;  %v360_v49 = vadd.f32 %v332_v36, %v275_v40  ;;  %v277_v50 = vadd.f32 %v330_v26, %v249_v42  ;;  %v335_v51 = vmul.f32 0.25, %v1050_v38  ;;  %v251_v52 = vmul.f32 0.5, %v1049_v33  ;;  %v432_v26 = vld [vmem:[#allocation2 + $0x8] sm:$0x3f] }
  0x25   : > { %389 = vst.msk [vmem:[#allocation2 + $0x78] sm:$0xff] %vm375_vm0, %v359_v44  ;;  %v361_v54 = vadd.f32 %v333_v41, %v276_v45  ;;  %v278_v55 = vadd.f32 %v331_v31, %v250_v47  ;;  %v336_v56 = vmul.f32 0.25, %v1051_v43  ;;  %v252_v57 = vmul.f32 0.5, %v1050_v38  ;;  %v496_v31 = vld [vmem:[#allocation2 + $0x9] sm:$0x3f]  ;;  %v525_v38 = vld [vmem:[#allocation2 + $0xf1] sm:$0xff] }
  0x26   : > { %390 = vst.msk [vmem:[#allocation2 + $0x80] sm:$0xff] %vm375_vm0, %v360_v49  ;;  %v362_v59 = vadd.f32 %v334_v46, %v277_v50  ;;  %v279_v60 = vadd.f32 %v332_v36, %v251_v52  ;;  %v337_v61 = vmul.f32 0.25, %v1052_v48  ;;  %v253_v62 = vmul.f32 0.5, %v1051_v43  ;;  %v462_v39 = vld [vmem:[#allocation2 + $0xf8] sm:$0x3f] }
  0x27   : > { %391 = vst.msk [vmem:[#allocation2 + $0x88] sm:$0xff] %vm375_vm0, %v361_v54  ;;  %v363_v0 = vadd.f32 %v335_v51, %v278_v55  ;;  %v280_v1 = vadd.f32 %v333_v41, %v252_v57  ;;  %v338_v2 = vmul.f32 0.25, %v1053_v53  ;;  %v254_v3 = vmul.f32 0.5, %v1052_v48  ;;  %v621_v43 = vld [vmem:[#allocation2 + $0xf2] sm:$0xff]  ;;  %v622_v45 = vld [vmem:[#allocation2 + $0xfa] sm:$0x3f] }
  0x28   : > { %392 = vst.msk [vmem:[#allocation2 + $0x90] sm:$0xff] %vm375_vm0, %v362_v59  ;;  %v364_v5 = vadd.f32 %v336_v56, %v279_v60  ;;  %v281_v6 = vadd.f32 %v334_v46, %v253_v62  ;;  %v339_v9 = vmul.f32 0.25, %v1054_v58  ;;  %v255_v11 = vmul.f32 0.5, %v1053_v53  ;;  %v526_v44 = vld [vmem:[#allocation2 + $0xf9] sm:$0x3f] }
  0x29   : > { %393 = vst.msk [vmem:[#allocation2 + $0x98] sm:$0xff] %vm375_vm0, %v363_v0  ;;  %v365_v14 = vadd.f32 %v337_v61, %v280_v1  ;;  %v282_v15 = vadd.f32 %v335_v51, %v254_v3  ;;  %v340_v17 = vmul.f32 0.25, %v1055_v63  ;;  %v256_v18 = vmul.f32 0.5, %v1054_v58  ;;  %v720_v48 = vld [vmem:[#allocation2] sm:$0x1] }
  0x2a   : > { %394 = vst.msk [vmem:[#allocation2 + $0xa0] sm:$0xff] %vm375_vm0, %v364_v5  ;;  %v366_v20 = vadd.f32 %v338_v2, %v281_v6  ;;  %v283_v21 = vadd.f32 %v336_v56, %v255_v11  ;;  %v341_v22 = vmul.f32 0.25, %v1056_v4  ;;  %v257_v23 = vmul.f32 0.5, %v1055_v63  ;;  %v752_v49 = vld [vmem:[#allocation2 + $0x1] sm:$0x1] }
  0x2b   : > { %395 = vst.msk [vmem:[#allocation2 + $0xa8] sm:$0xff] %vm375_vm0, %v365_v14  ;;  %v367_v27 = vadd.f32 %v339_v9, %v282_v15  ;;  %v284_v28 = vadd.f32 %v337_v61, %v256_v18  ;;  %v258_v29 = vmul.f32 0.5, %v1056_v4  ;;  %v259_v30 = vmul.f32 0.5, %v1162_v7  ;;  %v721_v50 = vld [vmem:[#allocation2 + $0x10] sm:$0x1] }
  0x2c   : > { %396 = vst.msk [vmem:[#allocation2 + $0xb0] sm:$0xff] %vm375_vm0, %v366_v20  ;;  %v368_v33 = vadd.f32 %v340_v17, %v283_v21  ;;  %v285_v34 = vadd.f32 %v338_v2, %v257_v23  ;;  %v344_v35 = vmul.f32 0.25, %v1165_v8  ;;  %v260_v36 = vmul.f32 0.5, %v1172_v12  ;;  %v753_v54 = vld [vmem:[#allocation2 + $0x11] sm:$0x1] }
  0x2d   : > { %397 = vst.msk [vmem:[#allocation2 + $0xb8] sm:$0xff] %vm375_vm0, %v367_v27  ;;  %v369_v40 = vadd.f32 %v341_v22, %v284_v28  ;;  %v286_v41 = vadd.f32 %v339_v9, %v258_v29  ;;  %v287_v7 = vadd.f32 %v340_v17, %v259_v30  ;;  %v345_v42 = vmul.f32 0.25, %v1175_v13  ;;  %v722_v55 = vld [vmem:[#allocation2 + $0x20] sm:$0x1]  ;;  %v754_v59 = vld [vmem:[#allocation2 + $0x21] sm:$0x1] }
  0x2e   : > { %398 = vst.msk [vmem:[#allocation2 + $0xc0] sm:$0xff] %vm375_vm0, %v368_v33  ;;  %v370_v8 = vadd.f32 %v1168_v10, %v285_v34  ;;  %v288_v46 = vadd.f32 %v341_v22, %v260_v36  ;;  %v463_v12 = vmul.f32 0.25, %v431_v19  ;;  %v527_v47 = vmul.f32 0.5, %v495_v24  ;;  %v723_v60 = vld [vmem:[#allocation2 + $0x30] sm:$0x1] }
  0x2f   : > { %399 = vst.msk [vmem:[#allocation2 + $0xc8] sm:$0xff] %vm375_vm0, %v369_v40  ;;  %v371_v51 = vadd.f32 %v1178_v16, %v286_v41  ;;  %v372_v52 = vadd.f32 %v344_v35, %v287_v7  ;;  %v623_v13 = vmul.f32 0.25, %v591_v25  ;;  %v464_v53 = vmul.f32 0.25, %v432_v26  ;;  %v755_v0 = vld [vmem:[#allocation2 + $0x31] sm:$0x1] }
  0x30   : > { %400 = vst.msk [vmem:[#allocation2 + $0xd0] sm:$0xff] %vm375_vm0, %v370_v8  ;;  %v373_v56 = vadd.f32 %v345_v42, %v288_v46  ;;  %v559_v10 = vadd.f32 %v527_v47, %v463_v12  ;;  %v528_v57 = vmul.f32 0.5, %v496_v31  ;;  %v624_v58 = vmul.f32 0.25, %v592_v32  ;;  %v724_v1 = vld [vmem:[#allocation2 + $0x40] sm:$0x1] }
  0x31   : > { %401 = vst.msk [vmem:[#allocation2 + $0xd8] sm:$0xff] %vm375_vm0, %v371_v51  ;;  %402 = vst.msk [vmem:[#allocation2 + $0xe0] sm:$0xff] %vm375_vm0, %v372_v52  ;;  %v493_v16 = vmul.f32 0.25, %v461_v37  ;;  %v557_v61 = vmul.f32 0.5, %v525_v38  ;;  %v653_v62 = vmul.f32 0.25, %v621_v43  ;;  %v494_v63 = vmul.f32 0.25, %v462_v39 }
  0x32   : > { %403 = vst.msk [vmem:[#allocation2 + $0xe8] sm:$0xff] %vm375_vm0, %v373_v56  ;;  %v655_v2 = vadd.f32 %v623_v13, %v559_v10  ;;  %v560_v3 = vadd.f32 %v528_v57, %v464_v53  ;;  %v558_v4 = vmul.f32 0.5, %v526_v44  ;;  %v654_v5 = vmul.f32 0.25, %v622_v45  ;;  %v756_v6 = vld [vmem:[#allocation2 + $0x41] sm:$0x1] }
  0x33   : > { %v725_v9 = vld [vmem:[#allocation2 + $0x50] sm:$0x1]  ;;  %v757_v11 = vld [vmem:[#allocation2 + $0x51] sm:$0x1]  ;;  %v589_v14 = vadd.f32 %v557_v61, %v493_v16  ;;  %v736_v15 = vmul.f32 0.5, %v720_v48  ;;  %v768_v17 = vmul.f32 0.25, %v752_v49 }
  0x34   : > { %v737_v18 = vmul.f32 0.5, %v721_v50  ;;  %v726_v19 = vld [vmem:[#allocation2 + $0x60] sm:$0x1]  ;;  %v758_v20 = vld [vmem:[#allocation2 + $0x61] sm:$0x1]  ;;  %687 = vst.msk [vmem:[%s1249_s16 + $0x1] sm:$0xff] %vm375_vm0, %v655_v2  ;;  %v656_v22 = vadd.f32 %v624_v58, %v560_v3  ;;  %v590_v23 = vadd.f32 %v558_v4, %v494_v63 }
  0x35   : > { %v727_v21 = vld [vmem:[#allocation2 + $0x70] sm:$0x1]  ;;  %v769_v24 = vmul.f32 0.25, %v753_v54  ;;  %v738_v25 = vmul.f32 0.5, %v722_v55  ;;  %v759_v26 = vld [vmem:[#allocation2 + $0x71] sm:$0x1]  ;;  %v685_v28 = vadd.f32 %v653_v62, %v589_v14  ;;  %v784_v29 = vadd.f32 %v768_v17, %v736_v15 }
  0x36   : > { %v728_v27 = vld [vmem:[#allocation2 + $0x80] sm:$0x1]  ;;  %v770_v30 = vmul.f32 0.25, %v754_v59  ;;  %v739_v31 = vmul.f32 0.5, %v723_v60  ;;  %v760_v32 = vld [vmem:[#allocation2 + $0x81] sm:$0x1]  ;;  %v686_v35 = vadd.f32 %v654_v5, %v590_v23 }
  0x37   : > { %v729_v33 = vld [vmem:[#allocation2 + $0x90] sm:$0x1]  ;;  %v761_v34 = vld [vmem:[#allocation2 + $0x91] sm:$0x1]  ;;  %689 = vst.msk [vmem:[%s1249_s16 + $0x9] sm:$0x3f] %vm688_vm1, %v656_v22  ;;  %v785_v36 = vadd.f32 %v769_v24, %v737_v18 }
  0x38   : > { %v771_v37 = vmul.f32 0.25, %v755_v0  ;;  %v740_v38 = vmul.f32 0.5, %v724_v1  ;;  %v730_v39 = vld [vmem:[#allocation2 + $0xa0] sm:$0x1]  ;;  %v762_v40 = vld [vmem:[#allocation2 + $0xa1] sm:$0x1]  ;;  %v786_v7 = vadd.f32 %v770_v30, %v738_v25 }
  0x39   : > { %v731_v41 = vld [vmem:[#allocation2 + $0xb0] sm:$0x1]  ;;  %718 = vst.msk [vmem:[%s1249_s16 + $0xf1] sm:$0xff] %vm375_vm0, %v685_v28  ;;  %v772_v42 = vmul.f32 0.25, %v756_v6  ;;  %v741_v43 = vmul.f32 0.5, %v725_v9  ;;  %v773_v44 = vmul.f32 0.25, %v757_v11 }
  0x3a   : > { %801 = vst.msk [vmem:[%s1249_s16] sm:$0x1] %vm800_vm2, %v784_v29  ;;  %v763_v45 = vld [vmem:[#allocation2 + $0xb1] sm:$0x1]  ;;  %v732_v8 = vld [vmem:[#allocation2 + $0xc0] sm:$0x1]  ;;  %v787_v46 = vadd.f32 %v771_v37, %v739_v31 }
  0x3b   : > { %719 = vst.msk [vmem:[%s1249_s16 + $0xf9] sm:$0x3f] %vm688_vm1, %v686_v35  ;;  %v742_v12 = vmul.f32 0.5, %v726_v19  ;;  %v774_v47 = vmul.f32 0.25, %v758_v20  ;;  %v743_v48 = vmul.f32 0.5, %v727_v21  ;;  %v788_v50 = vadd.f32 %v772_v42, %v740_v38 }
  0x3c   : > { %802 = vst.msk [vmem:[%s1249_s16 + $0x10] sm:$0x1] %vm800_vm2, %v785_v36  ;;  %v764_v49 = vld [vmem:[#allocation2 + $0xc1] sm:$0x1]  ;;  %803 = vst.msk [vmem:[%s1249_s16 + $0x20] sm:$0x1] %vm800_vm2, %v786_v7  ;;  %v789_v51 = vadd.f32 %v773_v44, %v741_v43 }
  0x3d   : > { %v775_v52 = vmul.f32 0.25, %v759_v26  ;;  %v744_v13 = vmul.f32 0.5, %v728_v27  ;;  %v733_v53 = vld [vmem:[#allocation2 + $0xd0] sm:$0x1]  ;;  %v765_v54 = vld [vmem:[#allocation2 + $0xd1] sm:$0x1]  ;;  %v790_v56 = vadd.f32 %v774_v47, %v742_v12 }
  0x3e   : > { %v735_v55 = vld [vmem:[#allocation2 + $0xf0] sm:$0x1]  ;;  %804 = vst.msk [vmem:[%s1249_s16 + $0x30] sm:$0x1] %vm800_vm2, %v787_v46  ;;  %v776_v10 = vmul.f32 0.25, %v760_v32  ;;  %v745_v57 = vmul.f32 0.5, %v729_v33 }
  0x3f   : > { %v777_v58 = vmul.f32 0.25, %v761_v34  ;;  %v734_v59 = vld [vmem:[#allocation2 + $0xe0] sm:$0x1]  ;;  %v767_v60 = vld [vmem:[#allocation2 + $0xf1] sm:$0x1]  ;;  %v791_v61 = vadd.f32 %v775_v52, %v743_v48  ;;  %v746_v62 = vmul.f32 0.5, %v730_v39 }
  0x40   : > { %v817_v16 = vld [vmem:[#allocation2 + $0xe] sm:$0x1]  ;;  %805 = vst.msk [vmem:[%s1249_s16 + $0x40] sm:$0x1] %vm800_vm2, %v788_v50  ;;  %806 = vst.msk [vmem:[%s1249_s16 + $0x50] sm:$0x1] %vm800_vm2, %v789_v51  ;;  %v792_v5 = vadd.f32 %v776_v10, %v744_v13 }
  0x41   : > { %v778_v63 = vmul.f32 0.25, %v762_v40  ;;  %v747_v0 = vmul.f32 0.5, %v731_v41  ;;  %v766_v1 = vld [vmem:[#allocation2 + $0xe1] sm:$0x1]  ;;  %v849_v2 = vld [vmem:[#allocation2 + $0xf] sm:$0x1]  ;;  %v793_v6 = vadd.f32 %v777_v58, %v745_v57 }
  0x42   : > { %v818_v3 = vld [vmem:[#allocation2 + $0x1e] sm:$0x1]  ;;  %v850_v4 = vld [vmem:[#allocation2 + $0x1f] sm:$0x1]  ;;  %807 = vst.msk [vmem:[%s1249_s16 + $0x60] sm:$0x1] %vm800_vm2, %v790_v56 }
  0x43   : > { %v779_v9 = vmul.f32 0.25, %v763_v45  ;;  %v748_v11 = vmul.f32 0.5, %v732_v8  ;;  %v819_v14 = vld [vmem:[#allocation2 + $0x2e] sm:$0x1]  ;;  %v851_v15 = vld [vmem:[#allocation2 + $0x2f] sm:$0x1]  ;;  %v794_v18 = vadd.f32 %v778_v63, %v746_v62 }
  0x44   : > { %v820_v17 = vld [vmem:[#allocation2 + $0x3e] sm:$0x1]  ;;  %808 = vst.msk [vmem:[%s1249_s16 + $0x70] sm:$0x1] %vm800_vm2, %v791_v61  ;;  %v780_v19 = vmul.f32 0.25, %v764_v49  ;;  %v749_v20 = vmul.f32 0.5, %v733_v53 }
  0x45   : > { %v781_v21 = vmul.f32 0.25, %v765_v54  ;;  %v852_v22 = vld [vmem:[#allocation2 + $0x3f] sm:$0x1]  ;;  %v821_v23 = vld [vmem:[#allocation2 + $0x4e] sm:$0x1]  ;;  %v795_v24 = vadd.f32 %v779_v9, %v747_v0  ;;  %v750_v25 = vmul.f32 0.5, %v734_v59 }
  0x46   : > { %809 = vst.msk [vmem:[%s1249_s16 + $0x80] sm:$0x1] %vm800_vm2, %v792_v5  ;;  %810 = vst.msk [vmem:[%s1249_s16 + $0x90] sm:$0x1] %vm800_vm2, %v793_v6  ;;  %v782_v26 = vmul.f32 0.25, %v766_v1  ;;  %v751_v27 = vmul.f32 0.5, %v735_v55  ;;  %v796_v31 = vadd.f32 %v780_v19, %v748_v11 }
  0x47   : > { %v853_v28 = vld [vmem:[#allocation2 + $0x4f] sm:$0x1]  ;;  %v822_v29 = vld [vmem:[#allocation2 + $0x5e] sm:$0x1]  ;;  %v854_v30 = vld [vmem:[#allocation2 + $0x5f] sm:$0x1]  ;;  %v797_v32 = vadd.f32 %v781_v21, %v749_v20 }
  0x48   : > { %811 = vst.msk [vmem:[%s1249_s16 + $0xa0] sm:$0x1] %vm800_vm2, %v794_v18  ;;  %v783_v33 = vmul.f32 0.25, %v767_v60  ;;  %v833_v34 = vmul.f32 0.25, %v817_v16  ;;  %v823_v35 = vld [vmem:[#allocation2 + $0x6e] sm:$0x1]  ;;  %v798_v38 = vadd.f32 %v782_v26, %v750_v25 }
  0x49   : > { %v855_v36 = vld [vmem:[#allocation2 + $0x6f] sm:$0x1]  ;;  %v824_v37 = vld [vmem:[#allocation2 + $0x7e] sm:$0x1]  ;;  %812 = vst.msk [vmem:[%s1249_s16 + $0xb0] sm:$0x1] %vm800_vm2, %v795_v24 }
  0x4a   : > { %v865_v39 = vmul.f32 0.5, %v849_v2  ;;  %v834_v40 = vmul.f32 0.25, %v818_v3  ;;  %v866_v41 = vmul.f32 0.5, %v850_v4  ;;  %v856_v7 = vld [vmem:[#allocation2 + $0x7f] sm:$0x1]  ;;  %v799_v43 = vadd.f32 %v783_v33, %v751_v27 }
  0x4b   : > { %v825_v42 = vld [vmem:[#allocation2 + $0x8e] sm:$0x1]  ;;  %813 = vst.msk [vmem:[%s1249_s16 + $0xc0] sm:$0x1] %vm800_vm2, %v796_v31  ;;  %814 = vst.msk [vmem:[%s1249_s16 + $0xd0] sm:$0x1] %vm800_vm2, %v797_v32 }
  0x4c   : > { %v835_v44 = vmul.f32 0.25, %v819_v14  ;;  %v867_v45 = vmul.f32 0.5, %v851_v15  ;;  %v836_v8 = vmul.f32 0.25, %v820_v17  ;;  %v857_v46 = vld [vmem:[#allocation2 + $0x8f] sm:$0x1]  ;;  %v881_v48 = vadd.f32 %v865_v39, %v833_v34  ;;  %v433_v17 = vld [vmem:[#allocation2 + $0x10] sm:$0xff] }
  0x4d   : > { %v826_v12 = vld [vmem:[#allocation2 + $0x9e] sm:$0x1]  ;;  %v858_v47 = vld [vmem:[#allocation2 + $0x9f] sm:$0x1]  ;;  %815 = vst.msk [vmem:[%s1249_s16 + $0xe0] sm:$0x1] %vm800_vm2, %v798_v38  ;;  %v882_v49 = vadd.f32 %v866_v41, %v834_v40 }
  0x4e   : > { %v868_v50 = vmul.f32 0.5, %v852_v22  ;;  %v837_v51 = vmul.f32 0.25, %v821_v23  ;;  %v827_v52 = vld [vmem:[#allocation2 + $0xae] sm:$0x1]  ;;  %v859_v13 = vld [vmem:[#allocation2 + $0xaf] sm:$0x1]  ;;  %v883_v54 = vadd.f32 %v867_v45, %v835_v44 }
  0x4f   : > { %v828_v53 = vld [vmem:[#allocation2 + $0xbe] sm:$0x1]  ;;  %816 = vst.msk [vmem:[%s1249_s16 + $0xf0] sm:$0x1] %vm800_vm2, %v799_v43  ;;  %v869_v55 = vmul.f32 0.5, %v853_v28  ;;  %v838_v56 = vmul.f32 0.25, %v822_v29 }
  0x50   : > { %v870_v10 = vmul.f32 0.5, %v854_v30  ;;  %v860_v57 = vld [vmem:[#allocation2 + $0xbf] sm:$0x1]  ;;  %v829_v58 = vld [vmem:[#allocation2 + $0xce] sm:$0x1]  ;;  %v884_v59 = vadd.f32 %v868_v50, %v836_v8  ;;  %v839_v60 = vmul.f32 0.25, %v823_v35 }
  0x51   : > { %897 = vst.msk [vmem:[%s1249_s16 + $0xf] sm:$0x1] %vm800_vm2, %v881_v48  ;;  %898 = vst.msk [vmem:[%s1249_s16 + $0x1f] sm:$0x1] %vm800_vm2, %v882_v49  ;;  %v871_v16 = vmul.f32 0.5, %v855_v36  ;;  %v840_v61 = vmul.f32 0.25, %v824_v37  ;;  %v885_v0 = vadd.f32 %v869_v55, %v837_v51 }
  0x52   : > { %v861_v62 = vld [vmem:[#allocation2 + $0xcf] sm:$0x1]  ;;  %v830_v63 = vld [vmem:[#allocation2 + $0xde] sm:$0x1]  ;;  %899 = vst.msk [vmem:[%s1249_s16 + $0x2f] sm:$0x1] %vm800_vm2, %v883_v54  ;;  %v886_v1 = vadd.f32 %v870_v10, %v838_v56 }
  0x53   : > { %v872_v2 = vmul.f32 0.5, %v856_v7  ;;  %v841_v3 = vmul.f32 0.25, %v825_v42  ;;  %v862_v4 = vld [vmem:[#allocation2 + $0xdf] sm:$0x1]  ;;  %v831_v5 = vld [vmem:[#allocation2 + $0xee] sm:$0x1]  ;;  %v887_v6 = vadd.f32 %v871_v16, %v839_v60 }
  0x54   : > { %900 = vst.msk [vmem:[%s1249_s16 + $0x3f] sm:$0x1] %vm800_vm2, %v884_v59  ;;  %v873_v9 = vmul.f32 0.5, %v857_v46  ;;  %v842_v11 = vmul.f32 0.25, %v826_v12  ;;  %v874_v14 = vmul.f32 0.5, %v858_v47  ;;  %v843_v19 = vmul.f32 0.25, %v827_v52 }
  0x55   : > { %v863_v15 = vld [vmem:[#allocation2 + $0xef] sm:$0x1]  ;;  %901 = vst.msk [vmem:[%s1249_s16 + $0x4f] sm:$0x1] %vm800_vm2, %v885_v0  ;;  %902 = vst.msk [vmem:[%s1249_s16 + $0x5f] sm:$0x1] %vm800_vm2, %v886_v1  ;;  %v888_v18 = vadd.f32 %v872_v2, %v840_v61 }
  0x56   : > { %v875_v20 = vmul.f32 0.5, %v859_v13  ;;  %v844_v21 = vmul.f32 0.25, %v828_v53  ;;  %v832_v22 = vld [vmem:[#allocation2 + $0xfe] sm:$0x1]  ;;  %v497_v23 = vld [vmem:[#allocation2 + $0x11] sm:$0xff]  ;;  %v889_v24 = vadd.f32 %v873_v9, %v841_v3  ;;  %v890_v25 = vadd.f32 %v874_v14, %v842_v11  ;;  %v435_v30 = vld [vmem:[#allocation2 + $0x20] sm:$0xff] }
  0x57   : > { %903 = vst.msk [vmem:[%s1249_s16 + $0x6f] sm:$0x1] %vm800_vm2, %v887_v6  ;;  %v876_v26 = vmul.f32 0.5, %v860_v57  ;;  %v845_v27 = vmul.f32 0.25, %v829_v58  ;;  %v864_v28 = vld [vmem:[#allocation2 + $0xff] sm:$0x1] }
  0x58   : > { %v593_v29 = vld [vmem:[#allocation2 + $0x12] sm:$0xff]  ;;  %904 = vst.msk [vmem:[%s1249_s16 + $0x7f] sm:$0x1] %vm800_vm2, %v888_v18  ;;  %v891_v31 = vadd.f32 %v875_v20, %v843_v19  ;;  %v877_v32 = vmul.f32 0.5, %v861_v62  ;;  %v846_v33 = vmul.f32 0.25, %v830_v63  ;;  %v878_v34 = vmul.f32 0.5, %v862_v4 }
  0x59   : > { %v434_v35 = vld [vmem:[#allocation2 + $0x18] sm:$0x3f]  ;;  %v499_v36 = vld [vmem:[#allocation2 + $0x21] sm:$0xff]  ;;  %905 = vst.msk [vmem:[%s1249_s16 + $0x8f] sm:$0x1] %vm800_vm2, %v889_v24  ;;  %v892_v37 = vadd.f32 %v876_v26, %v844_v21  ;;  %v847_v38 = vmul.f32 0.25, %v831_v5 }
  0x5a   : > { %906 = vst.msk [vmem:[%s1249_s16 + $0x9f] sm:$0x1] %vm800_vm2, %v890_v25  ;;  %v879_v39 = vmul.f32 0.5, %v863_v15  ;;  %v848_v40 = vmul.f32 0.25, %v832_v22  ;;  %v498_v41 = vld [vmem:[#allocation2 + $0x19] sm:$0x3f]  ;;  %v893_v43 = vadd.f32 %v877_v32, %v845_v27  ;;  %v894_v44 = vadd.f32 %v878_v34, %v846_v33 }
  0x5b   : > { %v595_v7 = vld [vmem:[#allocation2 + $0x22] sm:$0xff]  ;;  %v437_v42 = vld [vmem:[#allocation2 + $0x30] sm:$0xff]  ;;  %907 = vst.msk [vmem:[%s1249_s16 + $0xaf] sm:$0x1] %vm800_vm2, %v891_v31  ;;  %v880_v45 = vmul.f32 0.5, %v864_v28  ;;  %v465_v8 = vmul.f32 0.25, %v433_v17 }
  0x5c   : > { %v594_v46 = vld [vmem:[#allocation2 + $0x1a] sm:$0x3f]  ;;  %v436_v12 = vld [vmem:[#allocation2 + $0x28] sm:$0x3f]  ;;  %908 = vst.msk [vmem:[%s1249_s16 + $0xbf] sm:$0x1] %vm800_vm2, %v892_v37  ;;  %v895_v47 = vadd.f32 %v879_v39, %v847_v38 }
  0x5d   : > { %v529_v48 = vmul.f32 0.5, %v497_v23  ;;  %v466_v49 = vmul.f32 0.25, %v434_v35  ;;  %v500_v50 = vld [vmem:[#allocation2 + $0x29] sm:$0x3f]  ;;  %909 = vst.msk [vmem:[%s1249_s16 + $0xcf] sm:$0x1] %vm800_vm2, %v893_v43  ;;  %v896_v52 = vadd.f32 %v880_v45, %v848_v40 }
  0x5e   : > { %v596_v51 = vld [vmem:[#allocation2 + $0x2a] sm:$0x3f]  ;;  %910 = vst.msk [vmem:[%s1249_s16 + $0xdf] sm:$0x1] %vm800_vm2, %v894_v44  ;;  %v625_v13 = vmul.f32 0.25, %v593_v29  ;;  %v530_v53 = vmul.f32 0.5, %v498_v41 }
  0x5f   : > { %v467_v54 = vmul.f32 0.25, %v435_v30  ;;  %v501_v55 = vld [vmem:[#allocation2 + $0x31] sm:$0xff]  ;;  %911 = vst.msk [vmem:[%s1249_s16 + $0xef] sm:$0x1] %vm800_vm2, %v895_v47  ;;  %v561_v10 = vadd.f32 %v529_v48, %v465_v8  ;;  %v626_v57 = vmul.f32 0.25, %v594_v46  ;;  %v531_v58 = vmul.f32 0.5, %v499_v36 }
  0x60   : > { %v438_v56 = vld [vmem:[#allocation2 + $0x38] sm:$0x3f]  ;;  %v468_v59 = vmul.f32 0.25, %v436_v12  ;;  %912 = vst.msk [vmem:[%s1249_s16 + $0xff] sm:$0x1] %vm800_vm2, %v896_v52  ;;  %v562_v16 = vadd.f32 %v530_v53, %v466_v49  ;;  %v627_v61 = vmul.f32 0.25, %v595_v7 }
  0x61   : > { %v502_v60 = vld [vmem:[#allocation2 + $0x39] sm:$0x3f]  ;;  %v532_v62 = vmul.f32 0.5, %v500_v50  ;;  %v469_v63 = vmul.f32 0.25, %v437_v42  ;;  %v439_v1 = vld [vmem:[#allocation2 + $0x40] sm:$0xff]  ;;  %v657_v2 = vadd.f32 %v625_v13, %v561_v10  ;;  %v563_v3 = vadd.f32 %v531_v58, %v467_v54  ;;  %v441_v26 = vld [vmem:[#allocation2 + $0x50] sm:$0xff] }
  0x62   : > { %v597_v0 = vld [vmem:[#allocation2 + $0x32] sm:$0xff]  ;;  %v628_v4 = vmul.f32 0.25, %v596_v51  ;;  %v533_v5 = vmul.f32 0.5, %v501_v55  ;;  %v598_v6 = vld [vmem:[#allocation2 + $0x3a] sm:$0x3f]  ;;  %v503_v9 = vld [vmem:[#allocation2 + $0x41] sm:$0xff]  ;;  %v658_v14 = vadd.f32 %v626_v57, %v562_v16 }
  0x63   : > { %v599_v11 = vld [vmem:[#allocation2 + $0x42] sm:$0xff]  ;;  %v564_v15 = vadd.f32 %v532_v62, %v468_v59  ;;  %v470_v17 = vmul.f32 0.25, %v438_v56  ;;  %v534_v18 = vmul.f32 0.5, %v502_v60  ;;  %690 = vst.msk [vmem:[%s1249_s16 + $0x11] sm:$0xff] %vm375_vm0, %v657_v2  ;;  %v659_v21 = vadd.f32 %v627_v61, %v563_v3  ;;  %v600_v25 = vld [vmem:[#allocation2 + $0x4a] sm:$0x3f] }
  0x64   : > { %v440_v19 = vld [vmem:[#allocation2 + $0x48] sm:$0x3f]  ;;  %v565_v22 = vadd.f32 %v533_v5, %v469_v63  ;;  %v629_v23 = vmul.f32 0.25, %v597_v0  ;;  %v471_v24 = vmul.f32 0.25, %v439_v1  ;;  %v505_v27 = vld [vmem:[#allocation2 + $0x51] sm:$0xff]  ;;  %v630_v30 = vmul.f32 0.25, %v598_v6 }
  0x65   : > { %v504_v20 = vld [vmem:[#allocation2 + $0x49] sm:$0x3f]  ;;  %691 = vst.msk [vmem:[%s1249_s16 + $0x19] sm:$0x3f] %vm688_vm1, %v658_v14  ;;  %v660_v28 = vadd.f32 %v628_v4, %v564_v15  ;;  %v566_v29 = vadd.f32 %v534_v18, %v470_v17  ;;  %v535_v31 = vmul.f32 0.5, %v503_v9  ;;  %v631_v35 = vmul.f32 0.25, %v599_v11 }
  0x66   : > { %v442_v32 = vld [vmem:[#allocation2 + $0x58] sm:$0x3f]  ;;  %692 = vst.msk [vmem:[%s1249_s16 + $0x21] sm:$0xff] %vm375_vm0, %v659_v21  ;;  %v661_v34 = vadd.f32 %v629_v23, %v565_v22  ;;  %v472_v36 = vmul.f32 0.25, %v440_v19  ;;  %v536_v37 = vmul.f32 0.5, %v504_v20  ;;  %v443_v39 = vld [vmem:[#allocation2 + $0x60] sm:$0xff] }
  0x67   : > { %v506_v33 = vld [vmem:[#allocation2 + $0x59] sm:$0x3f]  ;;  %v507_v40 = vld [vmem:[#allocation2 + $0x61] sm:$0xff]  ;;  %693 = vst.msk [vmem:[%s1249_s16 + $0x29] sm:$0x3f] %vm688_vm1, %v660_v28  ;;  %v662_v41 = vadd.f32 %v630_v30, %v566_v29  ;;  %v567_v7 = vadd.f32 %v535_v31, %v471_v24  ;;  %v473_v42 = vmul.f32 0.25, %v441_v26 }
  0x68   : > { %v601_v38 = vld [vmem:[#allocation2 + $0x52] sm:$0xff]  ;;  %v537_v43 = vmul.f32 0.5, %v505_v27  ;;  %v602_v44 = vld [vmem:[#allocation2 + $0x5a] sm:$0x3f]  ;;  %v444_v45 = vld [vmem:[#allocation2 + $0x68] sm:$0x3f]  ;;  %v568_v8 = vadd.f32 %v536_v37, %v472_v36 }
  0x69   : > { %694 = vst.msk [vmem:[%s1249_s16 + $0x31] sm:$0xff] %vm375_vm0, %v661_v34  ;;  %v632_v46 = vmul.f32 0.25, %v600_v25  ;;  %v474_v12 = vmul.f32 0.25, %v442_v32  ;;  %v538_v47 = vmul.f32 0.5, %v506_v33  ;;  %v603_v48 = vld [vmem:[#allocation2 + $0x62] sm:$0xff]  ;;  %v663_v50 = vadd.f32 %v631_v35, %v567_v7  ;;  %v445_v54 = vld [vmem:[#allocation2 + $0x70] sm:$0xff] }
  0x6a   : > { %v508_v49 = vld [vmem:[#allocation2 + $0x69] sm:$0x3f]  ;;  %695 = vst.msk [vmem:[%s1249_s16 + $0x39] sm:$0x3f] %vm688_vm1, %v662_v41  ;;  %v569_v51 = vadd.f32 %v537_v43, %v473_v42  ;;  %v633_v52 = vmul.f32 0.25, %v601_v38  ;;  %v475_v13 = vmul.f32 0.25, %v443_v39 }
  0x6b   : > { %v604_v53 = vld [vmem:[#allocation2 + $0x6a] sm:$0x3f]  ;;  %v509_v55 = vld [vmem:[#allocation2 + $0x71] sm:$0xff]  ;;  %v664_v56 = vadd.f32 %v632_v46, %v568_v8  ;;  %v570_v10 = vadd.f32 %v538_v47, %v474_v12  ;;  %v634_v57 = vmul.f32 0.25, %v602_v44  ;;  %v539_v58 = vmul.f32 0.5, %v507_v40  ;;  %696 = vst.msk [vmem:[%s1249_s16 + $0x41] sm:$0xff] %vm375_vm0, %v663_v50 }
  0x6c   : > { %v446_v59 = vld [vmem:[#allocation2 + $0x78] sm:$0x3f]  ;;  %v665_v16 = vadd.f32 %v633_v52, %v569_v51  ;;  %v635_v61 = vmul.f32 0.25, %v603_v48  ;;  %v476_v62 = vmul.f32 0.25, %v444_v45  ;;  %v540_v63 = vmul.f32 0.5, %v508_v49  ;;  %v447_v1 = vld [vmem:[#allocation2 + $0x80] sm:$0xff] }
  0x6d   : > { %v510_v60 = vld [vmem:[#allocation2 + $0x79] sm:$0x3f]  ;;  %v511_v2 = vld [vmem:[#allocation2 + $0x81] sm:$0xff]  ;;  %697 = vst.msk [vmem:[%s1249_s16 + $0x49] sm:$0x3f] %vm688_vm1, %v664_v56  ;;  %v666_v3 = vadd.f32 %v634_v57, %v570_v10  ;;  %v571_v4 = vadd.f32 %v539_v58, %v475_v13  ;;  %v477_v5 = vmul.f32 0.25, %v445_v54 }
  0x6e   : > { %v605_v0 = vld [vmem:[#allocation2 + $0x72] sm:$0xff]  ;;  %v541_v6 = vmul.f32 0.5, %v509_v55  ;;  %v606_v9 = vld [vmem:[#allocation2 + $0x7a] sm:$0x3f]  ;;  %v448_v11 = vld [vmem:[#allocation2 + $0x88] sm:$0x3f]  ;;  %v572_v14 = vadd.f32 %v540_v63, %v476_v62 }
  0x6f   : > { %698 = vst.msk [vmem:[%s1249_s16 + $0x51] sm:$0xff] %vm375_vm0, %v665_v16  ;;  %v636_v15 = vmul.f32 0.25, %v604_v53  ;;  %v478_v17 = vmul.f32 0.25, %v446_v59  ;;  %v542_v18 = vmul.f32 0.5, %v510_v60  ;;  %v607_v19 = vld [vmem:[#allocation2 + $0x82] sm:$0xff]  ;;  %v667_v21 = vadd.f32 %v635_v61, %v571_v4  ;;  %v449_v26 = vld [vmem:[#allocation2 + $0x90] sm:$0xff] }
  0x70   : > { %v512_v20 = vld [vmem:[#allocation2 + $0x89] sm:$0x3f]  ;;  %699 = vst.msk [vmem:[%s1249_s16 + $0x59] sm:$0x3f] %vm688_vm1, %v666_v3  ;;  %v573_v22 = vadd.f32 %v541_v6, %v477_v5  ;;  %v637_v23 = vmul.f32 0.25, %v605_v0  ;;  %v479_v24 = vmul.f32 0.25, %v447_v1 }
  0x71   : > { %v608_v25 = vld [vmem:[#allocation2 + $0x8a] sm:$0x3f]  ;;  %v513_v27 = vld [vmem:[#allocation2 + $0x91] sm:$0xff]  ;;  %v668_v28 = vadd.f32 %v636_v15, %v572_v14  ;;  %v574_v29 = vadd.f32 %v542_v18, %v478_v17  ;;  %v638_v30 = vmul.f32 0.25, %v606_v9  ;;  %v543_v31 = vmul.f32 0.5, %v511_v2  ;;  %700 = vst.msk [vmem:[%s1249_s16 + $0x61] sm:$0xff] %vm375_vm0, %v667_v21 }
  0x72   : > { %v450_v32 = vld [vmem:[#allocation2 + $0x98] sm:$0x3f]  ;;  %v669_v34 = vadd.f32 %v637_v23, %v573_v22  ;;  %v639_v35 = vmul.f32 0.25, %v607_v19  ;;  %v480_v36 = vmul.f32 0.25, %v448_v11  ;;  %v544_v37 = vmul.f32 0.5, %v512_v20  ;;  %v451_v39 = vld [vmem:[#allocation2 + $0xa0] sm:$0xff] }
  0x73   : > { %v514_v33 = vld [vmem:[#allocation2 + $0x99] sm:$0x3f]  ;;  %v515_v40 = vld [vmem:[#allocation2 + $0xa1] sm:$0xff]  ;;  %701 = vst.msk [vmem:[%s1249_s16 + $0x69] sm:$0x3f] %vm688_vm1, %v668_v28  ;;  %v670_v41 = vadd.f32 %v638_v30, %v574_v29  ;;  %v575_v7 = vadd.f32 %v543_v31, %v479_v24  ;;  %v481_v42 = vmul.f32 0.25, %v449_v26 }
  0x74   : > { %v609_v38 = vld [vmem:[#allocation2 + $0x92] sm:$0xff]  ;;  %v545_v43 = vmul.f32 0.5, %v513_v27  ;;  %v610_v44 = vld [vmem:[#allocation2 + $0x9a] sm:$0x3f]  ;;  %v452_v45 = vld [vmem:[#allocation2 + $0xa8] sm:$0x3f]  ;;  %v576_v8 = vadd.f32 %v544_v37, %v480_v36 }
  0x75   : > { %702 = vst.msk [vmem:[%s1249_s16 + $0x71] sm:$0xff] %vm375_vm0, %v669_v34  ;;  %v640_v46 = vmul.f32 0.25, %v608_v25  ;;  %v482_v12 = vmul.f32 0.25, %v450_v32  ;;  %v546_v47 = vmul.f32 0.5, %v514_v33  ;;  %v611_v48 = vld [vmem:[#allocation2 + $0xa2] sm:$0xff]  ;;  %v671_v50 = vadd.f32 %v639_v35, %v575_v7  ;;  %v453_v54 = vld [vmem:[#allocation2 + $0xb0] sm:$0xff] }
  0x76   : > { %v516_v49 = vld [vmem:[#allocation2 + $0xa9] sm:$0x3f]  ;;  %703 = vst.msk [vmem:[%s1249_s16 + $0x79] sm:$0x3f] %vm688_vm1, %v670_v41  ;;  %v577_v51 = vadd.f32 %v545_v43, %v481_v42  ;;  %v641_v52 = vmul.f32 0.25, %v609_v38  ;;  %v483_v13 = vmul.f32 0.25, %v451_v39 }
  0x77   : > { %v612_v53 = vld [vmem:[#allocation2 + $0xaa] sm:$0x3f]  ;;  %v517_v55 = vld [vmem:[#allocation2 + $0xb1] sm:$0xff]  ;;  %v672_v56 = vadd.f32 %v640_v46, %v576_v8  ;;  %v578_v10 = vadd.f32 %v546_v47, %v482_v12  ;;  %v642_v57 = vmul.f32 0.25, %v610_v44  ;;  %v547_v58 = vmul.f32 0.5, %v515_v40  ;;  %704 = vst.msk [vmem:[%s1249_s16 + $0x81] sm:$0xff] %vm375_vm0, %v671_v50 }
  0x78   : > { %v454_v59 = vld [vmem:[#allocation2 + $0xb8] sm:$0x3f]  ;;  %v673_v16 = vadd.f32 %v641_v52, %v577_v51  ;;  %v643_v61 = vmul.f32 0.25, %v611_v48  ;;  %v484_v62 = vmul.f32 0.25, %v452_v45  ;;  %v548_v63 = vmul.f32 0.5, %v516_v49  ;;  %v455_v1 = vld [vmem:[#allocation2 + $0xc0] sm:$0xff] }
  0x79   : > { %v518_v60 = vld [vmem:[#allocation2 + $0xb9] sm:$0x3f]  ;;  %v519_v2 = vld [vmem:[#allocation2 + $0xc1] sm:$0xff]  ;;  %705 = vst.msk [vmem:[%s1249_s16 + $0x89] sm:$0x3f] %vm688_vm1, %v672_v56  ;;  %v674_v3 = vadd.f32 %v642_v57, %v578_v10  ;;  %v579_v4 = vadd.f32 %v547_v58, %v483_v13  ;;  %v485_v5 = vmul.f32 0.25, %v453_v54 }
  0x7a   : > { %v613_v0 = vld [vmem:[#allocation2 + $0xb2] sm:$0xff]  ;;  %v549_v6 = vmul.f32 0.5, %v517_v55  ;;  %v614_v9 = vld [vmem:[#allocation2 + $0xba] sm:$0x3f]  ;;  %v456_v11 = vld [vmem:[#allocation2 + $0xc8] sm:$0x3f]  ;;  %v580_v14 = vadd.f32 %v548_v63, %v484_v62 }
  0x7b   : > { %706 = vst.msk [vmem:[%s1249_s16 + $0x91] sm:$0xff] %vm375_vm0, %v673_v16  ;;  %v644_v15 = vmul.f32 0.25, %v612_v53  ;;  %v486_v17 = vmul.f32 0.25, %v454_v59  ;;  %v550_v18 = vmul.f32 0.5, %v518_v60  ;;  %v615_v19 = vld [vmem:[#allocation2 + $0xc2] sm:$0xff]  ;;  %v675_v21 = vadd.f32 %v643_v61, %v579_v4  ;;  %v457_v26 = vld [vmem:[#allocation2 + $0xd0] sm:$0xff] }
  0x7c   : > { %v520_v20 = vld [vmem:[#allocation2 + $0xc9] sm:$0x3f]  ;;  %707 = vst.msk [vmem:[%s1249_s16 + $0x99] sm:$0x3f] %vm688_vm1, %v674_v3  ;;  %v581_v22 = vadd.f32 %v549_v6, %v485_v5  ;;  %v645_v23 = vmul.f32 0.25, %v613_v0  ;;  %v487_v24 = vmul.f32 0.25, %v455_v1 }
  0x7d   : > { %v616_v25 = vld [vmem:[#allocation2 + $0xca] sm:$0x3f]  ;;  %v521_v27 = vld [vmem:[#allocation2 + $0xd1] sm:$0xff]  ;;  %v676_v28 = vadd.f32 %v644_v15, %v580_v14  ;;  %v582_v29 = vadd.f32 %v550_v18, %v486_v17  ;;  %v646_v30 = vmul.f32 0.25, %v614_v9  ;;  %v551_v31 = vmul.f32 0.5, %v519_v2  ;;  %708 = vst.msk [vmem:[%s1249_s16 + $0xa1] sm:$0xff] %vm375_vm0, %v675_v21 }
  0x7e   : > { %v458_v32 = vld [vmem:[#allocation2 + $0xd8] sm:$0x3f]  ;;  %v677_v34 = vadd.f32 %v645_v23, %v581_v22  ;;  %v647_v35 = vmul.f32 0.25, %v615_v19  ;;  %v488_v36 = vmul.f32 0.25, %v456_v11  ;;  %v552_v37 = vmul.f32 0.5, %v520_v20  ;;  %v459_v39 = vld [vmem:[#allocation2 + $0xe0] sm:$0xff] }
  0x7f   : > { %v522_v33 = vld [vmem:[#allocation2 + $0xd9] sm:$0x3f]  ;;  %v523_v40 = vld [vmem:[#allocation2 + $0xe1] sm:$0xff]  ;;  %709 = vst.msk [vmem:[%s1249_s16 + $0xa9] sm:$0x3f] %vm688_vm1, %v676_v28  ;;  %v678_v41 = vadd.f32 %v646_v30, %v582_v29  ;;  %v583_v7 = vadd.f32 %v551_v31, %v487_v24  ;;  %v489_v42 = vmul.f32 0.25, %v457_v26 }
  0x80   : > { %v617_v38 = vld [vmem:[#allocation2 + $0xd2] sm:$0xff]  ;;  %v553_v43 = vmul.f32 0.5, %v521_v27  ;;  %v618_v44 = vld [vmem:[#allocation2 + $0xda] sm:$0x3f]  ;;  %v460_v45 = vld [vmem:[#allocation2 + $0xe8] sm:$0x3f]  ;;  %v584_v8 = vadd.f32 %v552_v37, %v488_v36 }
  0x81   : > { %710 = vst.msk [vmem:[%s1249_s16 + $0xb1] sm:$0xff] %vm375_vm0, %v677_v34  ;;  %v648_v46 = vmul.f32 0.25, %v616_v25  ;;  %v490_v12 = vmul.f32 0.25, %v458_v32  ;;  %v554_v47 = vmul.f32 0.5, %v522_v33  ;;  %v524_v48 = vld [vmem:[#allocation2 + $0xe9] sm:$0x3f]  ;;  %v679_v49 = vadd.f32 %v647_v35, %v583_v7 }
  0x82   : > { %711 = vst.msk [vmem:[%s1249_s16 + $0xb9] sm:$0x3f] %vm688_vm1, %v678_v41  ;;  %v585_v50 = vadd.f32 %v553_v43, %v489_v42  ;;  %v649_v51 = vmul.f32 0.25, %v617_v38  ;;  %v491_v52 = vmul.f32 0.25, %v459_v39  ;;  %v619_v13 = vld [vmem:[#allocation2 + $0xe2] sm:$0xff]  ;;  %v650_v55 = vmul.f32 0.25, %v618_v44 }
  0x83   : > { %v680_v53 = vadd.f32 %v648_v46, %v584_v8  ;;  %v586_v54 = vadd.f32 %v554_v47, %v490_v12  ;;  %v555_v56 = vmul.f32 0.5, %v523_v40  ;;  %v620_v10 = vld [vmem:[#allocation2 + $0xea] sm:$0x3f]  ;;  %712 = vst.msk [vmem:[%s1249_s16 + $0xc1] sm:$0xff] %vm375_vm0, %v679_v49  ;;  %v492_v58 = vmul.f32 0.25, %v460_v45 }
  0x84   : > { %v681_v57 = vadd.f32 %v649_v51, %v585_v50  ;;  %v556_v59 = vmul.f32 0.5, %v524_v48  ;;  %v651_v61 = vmul.f32 0.25, %v619_v13  ;;  %v652_v63 = vmul.f32 0.25, %v620_v10 }
  0x85   : > { %713 = vst.msk [vmem:[%s1249_s16 + $0xc9] sm:$0x3f] %vm688_vm1, %v680_v53  ;;  %v682_v60 = vadd.f32 %v650_v55, %v586_v54  ;;  %v587_v16 = vadd.f32 %v555_v56, %v491_v52 }
  0x86   : > { %714 = vst.msk [vmem:[%s1249_s16 + $0xd1] sm:$0xff] %vm375_vm0, %v681_v57  ;;  %v588_v62 = vadd.f32 %v556_v59, %v492_v58 }
  0x87   : > { %715 = vst.msk [vmem:[%s1249_s16 + $0xd9] sm:$0x3f] %vm688_vm1, %v682_v60  ;;  %v683_v0 = vadd.f32 %v651_v61, %v587_v16 }
  0x88   : > { %v684_v1 = vadd.f32 %v652_v63, %v588_v62 }
  0x89   : > { %716 = vst.msk [vmem:[%s1249_s16 + $0xe1] sm:$0xff] %vm375_vm0, %v683_v0 }
  0x8a   : > { %717 = vst.msk [vmem:[%s1249_s16 + $0xe9] sm:$0x3f] %vm688_vm1, %v684_v1 }
  0x8b PF: > { %s11_s8 = sadd.s32 1, %s1117_s8   ;;  %s1391_s6 = smov %s1113_s7 }
  0x8c   : > { %p8_p5 = scmp.ge.s32.totalorder %s11_s8, 4   ;;  %s1392_s7 = smov %s1394_s9 }
  0x8e   :  { %10 = sbr.rel (!%p8_p5) target bundleno = 2 (0x2), region = 60 }

</bundles_post_ra>
